<compile_context>
chip_gen: v6e
topology: v6e:2x2x1
jax: 0.10.0
libtpu: 0.0.40
codegen_flags: <defaults>
</compile_context>

<pallas_src>
import functools

import numpy as np
import jax
import jax.numpy as jnp
from jax.experimental import pallas as pl
from jax.experimental.pallas import tpu as pltpu


def _round_up(x, m):
    return ((x + m - 1) // m) * m


def _cdiv(a, b):
    return -(-a // b)


def _unique_consecutive(labels_np):
    keep = np.ones(labels_np.shape[0], dtype=bool)
    if labels_np.shape[0] > 1:
        keep[1:] = labels_np[1:] != labels_np[:-1]
    return labels_np[keep]


def _l2_normalize(x, eps=1e-12):
    # torch.nn.functional.normalize(dim=-1): x / max(||x||, eps)
    n = jnp.sqrt(jnp.sum(x * x, axis=-1, keepdims=True))
    return x / jnp.maximum(n, eps)


def _proxy_sums_kernel(outer_ref, inner_ref, olab_ref, ilab_ref, cmask_ref,
                       out_pos_ref, out_neg_ref, *,
                       a_pos, b_pos, a_neg, b_neg, mask_inner):
    j = pl.program_id(2)   # reduced / streamed ("arbitrary") axis

    @pl.when(j == 0)
    def _init():
        out_pos_ref[...] = jnp.zeros_like(out_pos_ref)
        out_neg_ref[...] = jnp.zeros_like(out_neg_ref)

    # sims tile (block_outer, block_inner): MXU matmul with f32 accumulation.
    sims = jax.lax.dot_general(outer_ref[...], inner_ref[...],
                               (((1,), (1,)), ((), ())),
                               preferred_element_type=jnp.float32)

    # Rebuild same/diff from the tiny label vectors (no BxP mask traffic).
    same = olab_ref[...] == ilab_ref[...]            # (bo,1) == (1,bi) -> (bo,bi)

    # Fused margin math (fixed max bounds): e equals exp(w_pos - M_pos) on "same"
    # entries and exp(w_neg - M_neg) on "diff" entries; always <= ~1, no clamp needed.
    a = jnp.where(same, a_pos, a_neg)
    b = jnp.where(same, b_pos, b_neg)
    e = jnp.exp(a * sims + b)
    if mask_inner:
        e = e * cmask_ref[...]                        # zero out padded columns

    sp = jnp.sum(jnp.where(same, e, 0.0), axis=-1, keepdims=True)   # (bo, 1)
    sn = jnp.sum(e, axis=-1, keepdims=True) - sp                    # (bo, 1)

    out_pos_ref[...] += sp
    out_neg_ref[...] += sn


def proxy_loss(batch, proxies, labels, *, mode="anchor",
               pos_alpha=32.0, pos_delta=0.1, neg_alpha=32.0, neg_delta=-0.1,
               u_labels=None, matmul_dtype=jnp.bfloat16,
               block_outer=None, block_inner=None, n_splits=None):
    """ProxyAnchor (mode='anchor') / ProxyNCA (mode='nca') loss (forward only).

    TODO(synk): no custom_vjp is defined, so gradients do not flow through the
    pallas_call; training would require a backward kernel.
    """
    batch = jnp.asarray(batch, jnp.float32)
    proxies = jnp.asarray(proxies, jnp.float32)
    B, D = batch.shape
    P, D_p = proxies.shape
    if D_p != D:
        raise ValueError("batch and proxies must share the embedding dim")

    # torch.unique_consecutive equivalent (shapes must be static for the kernel).
    # TODO(synk): np.asarray(labels) forces a device->host sync; in a jitted training
    # step pass `u_labels` (e.g. arange(n_classes)) explicitly to stay on-device.
    if u_labels is None:
        u_np = _unique_consecutive(np.asarray(labels))
    else:
        u_np = np.asarray(u_labels)
    U = int(u_np.shape[0])
    if U == 1 and P != 1:
        u_np = np.broadcast_to(u_np, (P,))   # torch (B,1)-mask broadcast vs (B,P) sims
    elif U != P:
        raise ValueError(
            f"unique_consecutive(labels) has length {U}; torch's masked_fill only "
            f"broadcasts it against the {P} proxy columns when U == P (or U == 1).")

    labels_vec = jnp.asarray(labels, jnp.int32).reshape(-1)
    u_vec = jnp.asarray(np.ascontiguousarray(u_np), jnp.int32).reshape(-1)

    # Normalize once in f32, then cast for the MXU (halves streamed bytes with bf16).
    batch_n = _l2_normalize(batch).astype(matmul_dtype)
    proxies_n = _l2_normalize(proxies).astype(matmul_dtype)

    if mode == "nca":      # proxy_dim = 1: reduce over proxies -> stream proxies
        outer_mat, outer_lab, n_outer = batch_n, labels_vec, B
        inner_mat, inner_lab, n_inner = proxies_n, u_vec, P
    else:                  # 'anchor': proxy_dim = 0: reduce over batch -> stream batch
        outer_mat, outer_lab, n_outer = proxies_n, u_vec, P
        inner_mat, inner_lab, n_inner = batch_n, labels_vec, B

    d_pad = _round_up(D, 128)
    itemsize = jnp.dtype(matmul_dtype).itemsize
    row_align = max(8, 32 // itemsize)           # sublane packing granularity

    # Resident (outer) tile: keep >= 256 rows when possible for MXU / arithmetic
    # intensity (review); it is double-buffered so bound its footprint.
    if block_outer is None:
        cap = 256
        while cap > row_align and cap * d_pad * itemsize > (4 << 20):
            cap //= 2
        block_outer = min(cap, _round_up(n_outer, row_align))
    # Streamed (inner) tile: ~1M elements per buffer, 512..2048 lanes (review: larger
    # tiles amortize the ~0.35us/step overhead and issue bigger DMAs).
    if block_inner is None:
        cap = (1 << 20) // d_pad
        cap = max(512, min(2048, (cap // 128) * 128))
        block_inner = min(cap, _round_up(n_inner, 128))

    n_outer_pad = _round_up(n_outer, block_outer)
    n_outer_blocks = n_outer_pad // block_outer
    inner_blocks_total = _cdiv(_round_up(n_inner, 128), block_inner)

    # v7x has 2 TensorCores: guarantee >= 2 parallel blocks by splitting the reduced
    # axis when the non-reduced axis fits a single tile (partials summed in wrapper).
    if n_splits is None:
        n_splits = 2 if (n_outer_blocks == 1 and inner_blocks_total >= 2) else 1
    ibs = _cdiv(inner_blocks_total, n_splits)    # inner blocks per split
    n_inner_pad = block_inner * ibs * n_splits

    def pad2(x, rows, cols, value=0):
        r, c = x.shape
        if (r, c) == (rows, cols):
            return x
        return jnp.pad(x, ((0, rows - r), (0, cols - c)), constant_values=value)

    outer_p = pad2(outer_mat, n_outer_pad, d_pad)
    inner_p = pad2(inner_mat, n_inner_pad, d_pad)
    olab_p = pad2(outer_lab.reshape(n_outer, 1), n_outer_pad, 1)
    ilab_p = pad2(inner_lab.reshape(1, n_inner), 1, n_inner_pad)
    mask_inner = n_inner_pad != n_inner
    # Single lane-dense column-validity mask; makes label pad values irrelevant.
    cmask = (jnp.arange(n_inner_pad, dtype=jnp.int32) < n_inner
             ).astype(jnp.float32).reshape(1, n_inner_pad)

    # Fixed max bounds: |sims| <= 1 (+2% margin for bf16 rounding, +0.5 abs margin).
    m_pos = abs(pos_alpha) * 1.02 + pos_alpha * pos_delta + 0.5
    m_neg = abs(neg_alpha) * 1.02 - neg_alpha * neg_delta + 0.5
    a_pos, b_pos = -pos_alpha, pos_alpha * pos_delta - m_pos
    a_neg, b_neg = neg_alpha, -neg_alpha * neg_delta - m_neg

    kernel = functools.partial(
        _proxy_sums_kernel,
        a_pos=float(a_pos), b_pos=float(b_pos),
        a_neg=float(a_neg), b_neg=float(b_neg),
        mask_inner=mask_inner)

    grid = (n_splits, n_outer_blocks, ibs)
    out_rows = n_splits * n_outer_pad

    out_pos, out_neg = pl.pallas_call(
        kernel,
        out_shape=(jax.ShapeDtypeStruct((out_rows, 1), jnp.float32),
                   jax.ShapeDtypeStruct((out_rows, 1), jnp.float32)),
        grid_spec=pltpu.PrefetchScalarGridSpec(
            num_scalar_prefetch=0,
            grid=grid,
            in_specs=[
                pl.BlockSpec((block_outer, d_pad), lambda s, i, j: (i, 0)),            # resident
                pl.BlockSpec((block_inner, d_pad), lambda s, i, j: (s * ibs + j, 0)),  # streamed
                pl.BlockSpec((block_outer, 1), lambda s, i, j: (i, 0)),                # outer labels
                pl.BlockSpec((1, block_inner), lambda s, i, j: (0, s * ibs + j)),      # inner labels
                pl.BlockSpec((1, block_inner), lambda s, i, j: (0, s * ibs + j)),      # column valid
            ],
            out_specs=[
                pl.BlockSpec((block_outer, 1), lambda s, i, j: (s * n_outer_blocks + i, 0)),
                pl.BlockSpec((block_outer, 1), lambda s, i, j: (s * n_outer_blocks + i, 0)),
            ]),
        compiler_params=pltpu.CompilerParams(
            dimension_semantics=("parallel", "parallel", "arbitrary"),
            vmem_limit_bytes=40 * 1024 * 1024),
    )(outer_p, inner_p, olab_p, ilab_p, cmask)

    # Merge split partials, drop padded outer rows, finalize LSE (tiny XLA work).
    # mean(pos_s) + mean(neg_s): rows/cols with no masked entry contribute ~0 but
    # still count in the mean, exactly as in the torch code.
    s_pos = jnp.sum(out_pos.reshape(n_splits, n_outer_pad)[:, :n_outer], axis=0)
    s_neg = jnp.sum(out_neg.reshape(n_splits, n_outer_pad)[:, :n_outer], axis=0)
    lse_pos = m_pos + jnp.log(s_pos + np.exp(-m_pos))   # "+exp(-M)" = appended zero slice
    lse_neg = m_neg + jnp.log(s_neg + np.exp(-m_neg))
    return jnp.mean(lse_pos) + jnp.mean(lse_neg)


def _reference_loss(batch, proxies, labels, *, mode="anchor",
                    pos_alpha=32.0, pos_delta=0.1, neg_alpha=32.0, neg_delta=-0.1):
    """Pure-JAX transcription of the torch forward (testing only)."""
    labels_np = np.asarray(labels)
    u_np = _unique_consecutive(labels_np)
    same = jnp.asarray(labels_np[:, None] == u_np[None, :])
    diff = ~same
    dim = 1 if mode == "nca" else 0

    def norm(x):
        return x / jnp.maximum(jnp.linalg.norm(x, axis=-1, keepdims=True), 1e-12)

    sims = norm(batch) @ norm(proxies).T
    w_pos = -pos_alpha * (sims - pos_delta)
    w_neg = neg_alpha * (sims - neg_delta)

    def mlse(w, mask):
        m = jnp.where(mask, w, jnp.finfo(jnp.float32).min)
        zeros = jnp.zeros_like(jnp.sum(m, axis=dim, keepdims=True))
        cat = jnp.concatenate([m, zeros], axis=dim)
        mx = jnp.max(cat, axis=dim, keepdims=True)
        lse = mx + jnp.log(jnp.sum(jnp.exp(cat - mx), axis=dim, keepdims=True))
        return jnp.where(jnp.any(mask, axis=dim, keepdims=True), lse, 0.0)

    return jnp.mean(mlse(w_pos, same)) + jnp.mean(mlse(w_neg, diff))


if __name__ == "__main__":
    key = jax.random.PRNGKey(0)
    k1, k2, k3, k4 = jax.random.split(key, 4)

    # --- small toy shapes (single tile per grid axis) ---
    B, D, P = 8, 32, 8
    batch = jax.random.normal(k1, (B, D), dtype=jnp.float32)
    proxies = jax.random.normal(k2, (P, D), dtype=jnp.float32)
    labels = jnp.asarray([3, 1, 4, 0, 5, 2, 7, 6], dtype=jnp.int32)

    for mode in ("anchor", "nca"):
        ref = np.asarray(_reference_loss(batch, proxies, labels, mode=mode))
        loss_f32 = proxy_loss(batch, proxies, labels, mode=mode, matmul_dtype=jnp.float32)
        jax.block_until_ready(loss_f32)
        np.testing.assert_allclose(np.asarray(loss_f32), ref, rtol=1e-4, atol=1e-4)
        loss_bf16 = proxy_loss(batch, proxies, labels, mode=mode)  # default bf16 MXU path
        jax.block_until_ready(loss_bf16)
        np.testing.assert_allclose(np.asarray(loss_bf16), ref, rtol=5e-2, atol=5e-2)

    # --- multi-tile streaming path (forced small blocks to exercise accumulation) ---
    B2, D2, P2 = 160, 64, 20
    batch2 = jax.random.normal(k3, (B2, D2), dtype=jnp.float32)
    proxies2 = jax.random.normal(k4, (P2, D2), dtype=jnp.float32)
    labels2 = jnp.asarray(np.repeat(np.arange(P2), B2 // P2), dtype=jnp.int32)

    for mode in ("anchor", "nca"):
        ref = np.asarray(_reference_loss(batch2, proxies2, labels2, mode=mode))
        got = proxy_loss(batch2, proxies2, labels2, mode=mode,
                         matmul_dtype=jnp.float32, block_outer=8, block_inner=128)
        jax.block_until_ready(got)
        np.testing.assert_allclose(np.asarray(got), ref, rtol=1e-3, atol=1e-3)

    # --- forced split of the reduced axis (exercises the parallel-split merge path) ---
    ref = np.asarray(_reference_loss(batch2, proxies2, labels2, mode="anchor"))
    got = proxy_loss(batch2, proxies2, labels2, mode="anchor",
                     matmul_dtype=jnp.float32, block_outer=8, block_inner=128,
                     n_splits=2)
    jax.block_until_ready(got)
    np.testing.assert_allclose(np.asarray(got), ref, rtol=1e-3, atol=1e-3)

    print("KERNEL_OK")
</pallas_src>

<mosaic_0001>
module attributes {stable_mosaic.version = 11 : i64} {
  func.func @_proxy_sums_kernel(%arg0: i32, %arg1: i32, %arg2: i32, %arg3: memref<8x128xf32, #tpu.memory_space<vmem>>, %arg4: memref<128x128xf32, #tpu.memory_space<vmem>>, %arg5: memref<8x1xi32, #tpu.memory_space<vmem>>, %arg6: memref<1x128xi32, #tpu.memory_space<vmem>>, %arg7: memref<1x128xf32, #tpu.memory_space<vmem>>, %arg8: memref<8x1xf32, #tpu.memory_space<vmem>>, %arg9: memref<8x1xf32, #tpu.memory_space<vmem>>) attributes {dimension_semantics = [#tpu.dimension_semantics<parallel>, #tpu.dimension_semantics<parallel>, #tpu.dimension_semantics<arbitrary>], iteration_bounds = array<i64: 1, 1, 1>, scalar_prefetch = 0 : i64, scratch_operands = 0 : i64, tpu.core_type = #tpu.core_type<tc>, window_params = [{transform_indices = @transform_0, window_bounds = array<i64: 8, 128>}, {transform_indices = @transform_1, window_bounds = array<i64: 128, 128>}, {transform_indices = @transform_2, window_bounds = array<i64: 8, 1>}, {transform_indices = @transform_3, window_bounds = array<i64: 1, 128>}, {transform_indices = @transform_4, window_bounds = array<i64: 1, 128>}, {transform_indices = @transform_5, window_bounds = array<i64: 8, 1>}, {transform_indices = @transform_6, window_bounds = array<i64: 8, 1>}]} {
    %c0_i32 = arith.constant 0 : i32
    %0 = arith.cmpi eq, %arg2, %c0_i32 : i32
    %1 = arith.extui %0 : i1 to i32
    %c0_i32_0 = arith.constant 0 : i32
    %2 = arith.cmpi ne, %1, %c0_i32_0 : i32
    scf.if %2 {
      %cst_25 = arith.constant 0.000000e+00 : f32
      %36 = vector.broadcast %cst_25 : f32 to vector<8x1xf32>
      %c0_26 = arith.constant 0 : index
      %c0_27 = arith.constant 0 : index
      %37 = vector.load %arg8[%c0_26, %c0_27] : memref<8x1xf32, #tpu.memory_space<vmem>>, vector<8x1xf32>
      tpu.vector_store %arg8[%c0_26, %c0_27], %36 {strides = array<i32>} : memref<8x1xf32, #tpu.memory_space<vmem>>, vector<8x1xf32>,
      %cst_28 = arith.constant 0.000000e+00 : f32
      %38 = vector.broadcast %cst_28 : f32 to vector<8x1xf32>
      %c0_29 = arith.constant 0 : index
      %c0_30 = arith.constant 0 : index
      %39 = vector.load %arg9[%c0_29, %c0_30] : memref<8x1xf32, #tpu.memory_space<vmem>>, vector<8x1xf32>
      tpu.vector_store %arg9[%c0_29, %c0_30], %38 {strides = array<i32>} : memref<8x1xf32, #tpu.memory_space<vmem>>, vector<8x1xf32>,
    } else {
    }
    %c0 = arith.constant 0 : index
    %c0_1 = arith.constant 0 : index
    %3 = vector.load %arg3[%c0, %c0_1] : memref<8x128xf32, #tpu.memory_space<vmem>>, vector<8x128xf32>
    %c0_2 = arith.constant 0 : index
    %c0_3 = arith.constant 0 : index
    %4 = vector.load %arg4[%c0_2, %c0_3] : memref<128x128xf32, #tpu.memory_space<vmem>>, vector<128x128xf32>
    %cst = arith.constant dense<0.000000e+00> : vector<8x128xf32>
    %5 = tpu.matmul %3, %4, %cst {dimension_numbers = #tpu.dot_dimension_numbers<[1], [1], [0], [0], [0, 0, 1, 0], [], []>} : vector<8x128xf32>, vector<128x128xf32>, vector<8x128xf32> -> vector<8x128xf32>
    %c0_4 = arith.constant 0 : index
    %c0_5 = arith.constant 0 : index
    %6 = vector.load %arg5[%c0_4, %c0_5] : memref<8x1xi32, #tpu.memory_space<vmem>>, vector<8x1xi32>
    %c0_6 = arith.constant 0 : index
    %c0_7 = arith.constant 0 : index
    %7 = vector.load %arg6[%c0_6, %c0_7] : memref<1x128xi32, #tpu.memory_space<vmem>>, vector<1x128xi32>
    %8 = vector.broadcast %6 : vector<8x1xi32> to vector<8x128xi32>
    %9 = vector.broadcast %7 : vector<1x128xi32> to vector<8x128xi32>
    %10 = arith.cmpi eq, %8, %9 : vector<8x128xi32>
    %cst_8 = arith.constant -3.200000e+01 : f32
    %cst_9 = arith.constant 3.200000e+01 : f32
    %11 = vector.broadcast %cst_8 : f32 to vector<8x128xf32>
    %12 = vector.broadcast %cst_9 : f32 to vector<8x128xf32>
    %13 = arith.select %10, %11, %12 : vector<8x128xi1>, vector<8x128xf32>
    %cst_10 = arith.constant -3.314000e+01 : f32
    %cst_11 = arith.constant -3.314000e+01 : f32
    %14 = vector.broadcast %cst_10 : f32 to vector<8x128xf32>
    %15 = vector.broadcast %cst_11 : f32 to vector<8x128xf32>
    %16 = arith.select %10, %14, %15 : vector<8x128xi1>, vector<8x128xf32>
    %17 = arith.mulf %13, %5 : vector<8x128xf32>
    %18 = arith.addf %17, %16 : vector<8x128xf32>
    %19 = math.exp %18 : vector<8x128xf32>
    %c0_12 = arith.constant 0 : index
    %c0_13 = arith.constant 0 : index
    %20 = vector.load %arg7[%c0_12, %c0_13] : memref<1x128xf32, #tpu.memory_space<vmem>>, vector<1x128xf32>
    %21 = vector.broadcast %20 : vector<1x128xf32> to vector<8x128xf32>
    %22 = arith.mulf %19, %21 : vector<8x128xf32>
    %cst_14 = arith.constant 0.000000e+00 : f32
    %23 = vector.broadcast %cst_14 : f32 to vector<8x128xf32>
    %24 = arith.select %10, %22, %23 : vector<8x128xi1>, vector<8x128xf32>
    %cst_15 = arith.constant dense<0.000000e+00> : vector<8xf32>
    %25 = vector.multi_reduction <add>, %24, %cst_15 [1] : vector<8x128xf32> to vector<8xf32>
    %26 = vector.shape_cast %25 : vector<8xf32> to vector<8x1xf32>
    %cst_16 = arith.constant dense<0.000000e+00> : vector<8xf32>
    %27 = vector.multi_reduction <add>, %22, %cst_16 [1] : vector<8x128xf32> to vector<8xf32>
    %28 = vector.shape_cast %27 : vector<8xf32> to vector<8x1xf32>
    %29 = arith.subf %28, %26 : vector<8x1xf32>
    %c0_17 = arith.constant 0 : index
    %c0_18 = arith.constant 0 : index
    %30 = vector.load %arg8[%c0_17, %c0_18] : memref<8x1xf32, #tpu.memory_space<vmem>>, vector<8x1xf32>
    %31 = arith.addf %30, %26 : vector<8x1xf32>
    %c0_19 = arith.constant 0 : index
    %c0_20 = arith.constant 0 : index
    %32 = vector.load %arg8[%c0_19, %c0_20] : memref<8x1xf32, #tpu.memory_space<vmem>>, vector<8x1xf32>
    tpu.vector_store %arg8[%c0_19, %c0_20], %31 {strides = array<i32>} : memref<8x1xf32, #tpu.memory_space<vmem>>, vector<8x1xf32>,
    %c0_21 = arith.constant 0 : index
    %c0_22 = arith.constant 0 : index
    %33 = vector.load %arg9[%c0_21, %c0_22] : memref<8x1xf32, #tpu.memory_space<vmem>>, vector<8x1xf32>
    %34 = arith.addf %33, %29 : vector<8x1xf32>
    %c0_23 = arith.constant 0 : index
    %c0_24 = arith.constant 0 : index
    %35 = vector.load %arg9[%c0_23, %c0_24] : memref<8x1xf32, #tpu.memory_space<vmem>>, vector<8x1xf32>
    tpu.vector_store %arg9[%c0_23, %c0_24], %34 {strides = array<i32>} : memref<8x1xf32, #tpu.memory_space<vmem>>, vector<8x1xf32>,
    return
  }
  func.func @transform_0(%arg0: i32, %arg1: i32, %arg2: i32) -> (i32, i32) {
    %c0_i32 = arith.constant 0 : i32
    %c0_i32_0 = arith.constant 0 : i32
    return %arg1, %c0_i32 : i32, i32
  }
  func.func @transform_1(%arg0: i32, %arg1: i32, %arg2: i32) -> (i32, i32) {
    %c1_i32 = arith.constant 1 : i32
    %0 = arith.muli %arg0, %c1_i32 : i32
    %1 = arith.addi %0, %arg2 : i32
    %c0_i32 = arith.constant 0 : i32
    %c0_i32_0 = arith.constant 0 : i32
    return %1, %c0_i32 : i32, i32
  }
  func.func @transform_2(%arg0: i32, %arg1: i32, %arg2: i32) -> (i32, i32) {
    %c0_i32 = arith.constant 0 : i32
    %c0_i32_0 = arith.constant 0 : i32
    return %arg1, %c0_i32 : i32, i32
  }
  func.func @transform_3(%arg0: i32, %arg1: i32, %arg2: i32) -> (i32, i32) {
    %c1_i32 = arith.constant 1 : i32
    %0 = arith.muli %arg0, %c1_i32 : i32
    %1 = arith.addi %0, %arg2 : i32
    %c0_i32 = arith.constant 0 : i32
    %c0_i32_0 = arith.constant 0 : i32
    return %c0_i32, %1 : i32, i32
  }
  func.func @transform_4(%arg0: i32, %arg1: i32, %arg2: i32) -> (i32, i32) {
    %c1_i32 = arith.constant 1 : i32
    %0 = arith.muli %arg0, %c1_i32 : i32
    %1 = arith.addi %0, %arg2 : i32
    %c0_i32 = arith.constant 0 : i32
    %c0_i32_0 = arith.constant 0 : i32
    return %c0_i32, %1 : i32, i32
  }
  func.func @transform_5(%arg0: i32, %arg1: i32, %arg2: i32) -> (i32, i32) {
    %c1_i32 = arith.constant 1 : i32
    %0 = arith.muli %arg0, %c1_i32 : i32
    %1 = arith.addi %0, %arg1 : i32
    %c0_i32 = arith.constant 0 : i32
    %c0_i32_0 = arith.constant 0 : i32
    return %1, %c0_i32 : i32, i32
  }
  func.func @transform_6(%arg0: i32, %arg1: i32, %arg2: i32) -> (i32, i32) {
    %c1_i32 = arith.constant 1 : i32
    %0 = arith.muli %arg0, %c1_i32 : i32
    %1 = arith.addi %0, %arg1 : i32
    %c0_i32 = arith.constant 0 : i32
    %c0_i32_0 = arith.constant 0 : i32
    return %1, %c0_i32 : i32, i32
  }
}

</mosaic_0001>

<bundles_post_ra>
// kernel: tpu_custom_call.1
= control target key start
LH: loop header
LB: loop body
LE: loop exit
PB: predicated region body
PF: predicated region fallthrough
CT: control target
= control target key end

     0   :  { %12 = vsyncpa [#allocation3], 0  ;;  %s361_s21 = smov [#allocation2]   ;;  %s455_s0 = inlined_call_operand.vmem [shape: f32[8,128], index: 0, kind: input, shape index: {}]   ;;  %s456_s1 = inlined_call_operand.hbm [shape: f32[128,128], index: 1, kind: input, shape index: {}]   ;;  %s457_s2 = inlined_call_operand.vmem [shape: s32[8,1], index: 2, kind: input, shape index: {}]   ;;  %s458_s3 = inlined_call_operand.vmem [shape: s32[1,128], index: 3, kind: input, shape index: {}]   ;;  %s459_s4 = inlined_call_operand.vmem [shape: f32[1,128], index: 4, kind: input, shape index: {}]   ;;  %s460_s5 = inlined_call_operand.vmem [shape: f32[8,1], index: 5, kind: output, shape index: {0}]   ;;  %s461_s6 = inlined_call_operand.vmem [shape: f32[8,1], index: 6, kind: output, shape index: {1}]  }
   0x1   :  { %s24_s22 = sshll.u32 %s361_s21, 4  ;;  %s25_s22 = int_to_ptr.vmem [resolvable:$true] %s24_s22 }
   0x2   :  { %s347_s23 = scalar_lea.vmem %s25_s22, 2048  ;;  %p352_p1 = scmp.lt.s32.totalorder %s25_s22, %s25_s22 }
   0x3   :  { %p348_p0 = scmp.ne.s32.totalorder %s25_s22, %s347_s23  ;;  %p353_p2 = scmp.lt.s32.totalorder %s347_s23, %s347_s23 }
   0x5   :  { %p354_p3 = por %p353_p2, %p352_p1 }
   0x7   :  { %p355_p4 = pnand %p354_p3, %p348_p0 }
   0x9   :  { %358 = shalt.err (!%p355_p4)
}
   0xa   :  { %s362_s24 = smov 128   ;;  %s363_s25 = smov 8  }
   0xb   :  { %30 = dma.hbm_to_vmem [thread:$0]  %s456_s1, 2048, %s25_s22, [#allocation3], %s362_s24, %s362_s24, %s363_s25  }
   0xc   :  { %359 = dma.done.wait [#allocation3], 2048  }
   0xd   :  { %360 = vsyncadd [#allocation3], 4294965248  ;;  %v364_v0 = vmov 0.0   ;;  %vm365_vm0 = vmmov 0   ;;  %v366_v1 = vmov 0   ;;  %v115_v2 = vld [vmem:[#allocation2 + $0x78] sm:$0xff] }
   0xe   :  { %294 = vmatprep.subr.mxu0 %v364_v0  ;;  %326 = vmatprep.mubr.msk.f32.mxu0 %vm365_vm0, %v364_v0  ;;  %v114_v3 = vld [vmem:[#allocation2 + $0x70] sm:$0xff]  ;;  %v186_v4 = vld [vmem:[%s457_s2] sm:$0xff]  ;;  %v113_v5 = vld [vmem:[#allocation2 + $0x68] sm:$0xff]  ;;  %v367_v22 = vmov 32.0   ;;  %vm96_vm2 = vcmask 7168  }
   0xf   :  { %336 = vset.pattern.permute.xlu0 %v366_v1  ;;  %295 = vmatpush3.xpose.msra.mxu0 %v115_v2  ;;  %v112_v6 = vld [vmem:[#allocation2 + $0x60] sm:$0xff]  ;;  %v111_v7 = vld [vmem:[#allocation2 + $0x58] sm:$0xff]  ;;  %v110_v8 = vld [vmem:[#allocation2 + $0x50] sm:$0xff]  ;;  %97 = vst.msk [vmem:[%s460_s5] sm:$0xff] %vm96_vm2, %v364_v0 }
  0x10   :  { %296 = vmatprep.subr.mxu0 %v364_v0  ;;  %189 = vperm.xlu0 %336, %v186_v4   ;;  %v109_v9 = vld [vmem:[#allocation2 + $0x48] sm:$0xff]  ;;  %v108_v10 = vld [vmem:[#allocation2 + $0x40] sm:$0xff]  ;;  %v107_v11 = vld [vmem:[#allocation2 + $0x38] sm:$0xff]  ;;  %98 = vst.msk [vmem:[%s461_s6] sm:$0xff] %vm96_vm2, %v364_v0 }
  0x11   :  { %v106_v12 = vld [vmem:[#allocation2 + $0x30] sm:$0xff]  ;;  %v105_v13 = vld [vmem:[#allocation2 + $0x28] sm:$0xff]  ;;  %v104_v14 = vld [vmem:[#allocation2 + $0x20] sm:$0xff] }
  0x12   :  { %v103_v15 = vld [vmem:[#allocation2 + $0x18] sm:$0xff]  ;;  %v102_v16 = vld [vmem:[#allocation2 + $0x10] sm:$0xff]  ;;  %v101_v17 = vld [vmem:[#allocation2 + $0x8] sm:$0xff] }
  0x13   :  { %297 = vmatpush3.xpose.msra.mxu0 %v114_v3  ;;  %v100_v18 = vld [vmem:[#allocation2] sm:$0xff] }
  0x14   :  { %298 = vmatprep.subr.mxu0 %v364_v0  ;;  %v99_v19 = vld [vmem:[%s455_s0] sm:$0xff] }
  0x15   :  { %v275_v20 = vld [vmem:[%s458_s3] ss:$0 sm:$0xff] }
  0x16   :  { %v276_v29 = vld [vmem:[%s459_s4] ss:$0 sm:$0xff] }
  0x17   :  { %299 = vmatpush3.xpose.msra.mxu0 %v113_v5  ;;  %v215_v33 = vld [vmem:[%s460_s5] sm:$0xff] }
  0x18   :  { %300 = vmatprep.subr.mxu0 %v364_v0  ;;  %v219_v36 = vld [vmem:[%s461_s6] sm:$0xff] }
  0x1b   :  { %301 = vmatpush3.xpose.msra.mxu0 %v112_v6 }
  0x1c   :  { %302 = vmatprep.subr.mxu0 %v364_v0 }
  0x1f   :  { %303 = vmatpush3.xpose.msra.mxu0 %v111_v7 }
  0x20   :  { %304 = vmatprep.subr.mxu0 %v364_v0 }
  0x23   :  { %305 = vmatpush3.xpose.msra.mxu0 %v110_v8 }
  0x24   :  { %306 = vmatprep.subr.mxu0 %v364_v0 }
  0x27   :  { %307 = vmatpush3.xpose.msra.mxu0 %v109_v9 }
  0x28   :  { %308 = vmatprep.subr.mxu0 %v364_v0 }
  0x2b   :  { %309 = vmatpush3.xpose.msra.mxu0 %v108_v10 }
  0x2c   :  { %310 = vmatprep.subr.mxu0 %v364_v0 }
  0x2f   :  { %311 = vmatpush3.xpose.msra.mxu0 %v107_v11 }
  0x30   :  { %312 = vmatprep.subr.mxu0 %v364_v0 }
  0x33   :  { %313 = vmatpush3.xpose.msra.mxu0 %v106_v12 }
  0x34   :  { %314 = vmatprep.subr.mxu0 %v364_v0 }
  0x37   :  { %315 = vmatpush3.xpose.msra.mxu0 %v105_v13 }
  0x38   :  { %316 = vmatprep.subr.mxu0 %v364_v0 }
  0x3b   :  { %317 = vmatpush3.xpose.msra.mxu0 %v104_v14 }
  0x3c   :  { %318 = vmatprep.subr.mxu0 %v364_v0 }
  0x3f   :  { %319 = vmatpush3.xpose.msra.mxu0 %v103_v15 }
  0x40   :  { %320 = vmatprep.subr.mxu0 %v364_v0 }
  0x43   :  { %321 = vmatpush3.xpose.msra.mxu0 %v102_v16 }
  0x44   :  { %322 = vmatprep.subr.mxu0 %v364_v0 }
  0x47   :  { %323 = vmatpush3.xpose.msra.mxu0 %v101_v17 }
  0x48   :  { %324 = vmatprep.subr.mxu0 %v364_v0 }
  0x4b   :  { %325 = vmatpush3.xpose.msra.mxu0 %v100_v18 }
  0x4e   :  { %327 = vmatmul.mubr.f32.vlgmr.msra.gmra.mxu0 %v99_v19 }
  0x8b   :  { %v190_v21 = vpop.permute.xlu0 %189 }
  0x8c   :  { %vm195_vm1 = vcmp.eq.s32.totalorder %v190_v21, %v275_v20 }
  0x8d   :  { %v196_v23 = vsel %vm195_vm1, -32.0, %v367_v22 }
 0x10e   :  { %v182_v24 = vpop.f32.mrf.mxu0 }
 0x10f   :  { %v197_v25 = vmul.f32 %v196_v23, %v182_v24 }
 0x110   :  { %v328_v26 = vpop.f32.mrf.mxu0 }
 0x111   :  { %v198_v27 = vadd.f32 -33.14, %v197_v25 }
 0x113   :  { %v199_v28 = vmul.f32 1.442695, %v198_v27 }
 0x115   :  { %337 = vpow2.f32 %v199_v28 }
 0x122   :  { %v338_v30 = vpop.eup %337 }
 0x123   :  { %v208_v31 = vmul.f32 %v338_v30, %v276_v29 }
 0x125   :  { %212 = vadd.xlane.f32.xlu1 %v208_v31  ;;  %v209_v32 = vsel %vm195_vm1, %v208_v31, 0.0 }
 0x126   :  { %210 = vadd.xlane.f32.xlu0 %v209_v32 }
 0x1ae   :  { %v213_v34 = vpop.xlane.xlu1 %212 }
 0x1af   :  { %v211_v35 = vpop.xlane.xlu0 %210 }
 0x1b0   :  { %v214_v37 = vsub.f32 %v213_v34, %v211_v35  ;;  %v216_v38 = vadd.f32 %v215_v33, %v211_v35 }
 0x1b2   :  { %218 = vst.msk [vmem:[%s460_s5] sm:$0xff] %vm96_vm2, %v216_v38  ;;  %v220_v39 = vadd.f32 %v219_v36, %v214_v37 }
 0x1b4   :  { %221 = vst.msk [vmem:[%s461_s6] sm:$0xff] %vm96_vm2, %v220_v39 }
 0x1b5   :  { %252 = vsyncpa [#allocation3], 1 }

</bundles_post_ra>
